<compile_context>
chip_gen: v6e
topology: v6e:2x2x1
jax: 0.10.0
libtpu: 0.0.40
codegen_flags: <defaults>
</compile_context>

<pallas_src>
import jax
import jax.numpy as jnp
from jax.experimental import pallas as pl
from jax.experimental.pallas import tpu as pltpu


# ---------------------------------------------------------------------------
# Tile chooser: rows of output per grid step.
# ---------------------------------------------------------------------------
def _pick_row_tile(H, W, Cin, Cout, max_tm=2048, vmem_budget_bytes=8 << 20):
    """Pick th such that th | H (no ragged tails), th*W is lane-dense
    (multiple of 128, or the full H*W plane), and the double-buffered working
    set stays well inside every generation's scoped VMEM (v5e/v6e/v7x)."""
    best = None
    for th in range(1, H + 1):
        if H % th:
            continue
        tm = th * W
        lane_ok = (tm % 128 == 0) or (th == H)
        if not lane_ok:
            continue
        work = 4 * (2 * Cin * (th + 4) * W + 2 * Cout * tm + 9 * Cout * Cin)
        if work > vmem_budget_bytes:
            continue
        if best is not None and tm > max_tm:
            continue
        best = th
    return best if best is not None else H


# ---------------------------------------------------------------------------
# Kernel 1: fused im2col + conv matmul (transposed / lane-dense orientation)
#           + per-image BN partial sums (sum, sum-of-squares).
# ---------------------------------------------------------------------------
def _make_conv_stats_kernel(Cin, Cout, th, W):
    TM = th * W  # output pixels per tile (lane dimension)

    def kernel(x_ref, w_ref, y_ref, stats_ref, sum_ref, sq_ref):
        # x_ref:    (Cin, (th+4)*W)   padded row-slab for this (image, row-block)
        # w_ref:    (9, Cout, Cin)    tap t = 3*kh + kw
        # y_ref:    (Cout, TM)        conv output tile (NCHW-flat layout)
        # stats_ref:(Cout, 2)         per-image [sum, sumsq] (written at last j)
        # sum_ref/sq_ref: (Cout, 1)   VMEM scratch accumulators
        j = pl.program_id(1)

        @pl.when(j == 0)
        def _():
            sum_ref[...] = jnp.zeros_like(sum_ref)
            sq_ref[...] = jnp.zeros_like(sq_ref)

        x = x_ref[...]  # (Cin, (th+4)*W)

        # Column-edge validity masks (depend only on lane position w = p mod W).
        col = jax.lax.broadcasted_iota(jnp.int32, (1, TM), 1) % W
        not_left = col != 0           # tap kw=0 reads w-1: invalid at w == 0
        not_right = col != (W - 1)    # tap kw=2 reads w+1: invalid at w == W-1

        acc = jnp.zeros((Cout, TM), jnp.float32)
        for kh in range(3):
            for kw in range(3):
                # Static lane offset into the slab; always in-bounds because the
                # slab carries one extra (zero / masked) row above and below.
                s = (kh + 1) * W + (kw - 1)
                xt = x[:, s:s + TM]                      # (Cin, TM) shifted tap
                if kw == 0:
                    xt = jnp.where(not_left, xt, 0.0)
                elif kw == 2:
                    xt = jnp.where(not_right, xt, 0.0)
                wt = w_ref[3 * kh + kw]                  # (Cout, Cin)
                acc = acc + jnp.dot(wt, xt, preferred_element_type=jnp.float32)

        y_ref[...] = acc                                 # lane-dense full store

        # Per-channel BN partials for this image (lane/XLU reductions).
        sum_ref[...] += jnp.sum(acc, axis=1, keepdims=True)
        sq_ref[...] += jnp.sum(acc * acc, axis=1, keepdims=True)

        @pl.when(j == pl.num_programs(1) - 1)
        def _():
            stats_ref[:, 0:1] = sum_ref[...]
            stats_ref[:, 1:2] = sq_ref[...]

    return kernel


# ---------------------------------------------------------------------------
# Kernel 2: batchnorm (precomputed per-channel scale/shift) + ReLU.
# Operates on (Cout, TM) tiles — lane-dense, already NCHW-flat, so no final
# transpose is needed.
# ---------------------------------------------------------------------------
def bn_relu_kernel(y_ref, scale_ref, shift_ref, o_ref):
    o_ref[...] = jnp.maximum(y_ref[...] * scale_ref[...] + shift_ref[...], 0.0)


# ---------------------------------------------------------------------------
# Forward pass.
# ---------------------------------------------------------------------------
def conv_block_forward(x_nchw, w_oihw, bias, gamma, beta, eps=1e-5):
    """ConvBlock forward. x_nchw: (N, Cin, H, W) float32 -> (N, Cout, H, W)."""
    N, Cin, H, W = x_nchw.shape
    Cout = w_oihw.shape[0]

    # NOTE: `bias` is intentionally unused — a per-channel constant added before
    # training-mode BatchNorm cancels exactly in (y - mean); output is identical.
    del bias

    th = _pick_row_tile(H, W, Cin, Cout)
    num_j = H // th
    TM = th * W
    SLAB = (th + 4) * W

    x = x_nchw.astype(jnp.float32)
    # Pad H by 2 per side: 1 row is the conv zero-pad, 1 extra row keeps every
    # static in-kernel tap slice in-bounds (only masked positions touch it).
    xp = jnp.pad(x, ((0, 0), (0, 0), (2, 2), (0, 0)))          # (N,Cin,H+4,W)
    # Overlapping row-slabs with a small halo — the only materialized
    # intermediate (~(th+4)/th of the input; no 9x im2col, no transposes).
    slabs = jnp.stack(
        [xp[:, :, j * th: j * th + th + 4, :] for j in range(num_j)], axis=1)
    slabs = slabs.reshape(N, num_j, Cin, SLAB)

    # Weights -> (9, Cout, Cin), tap index t = 3*kh + kw.
    w_t = jnp.transpose(w_oihw, (2, 3, 0, 1)).reshape(9, Cout, Cin)
    w_t = w_t.astype(jnp.float32)

    # --- Pallas kernel 1: fused im2col conv + BN partial statistics ---------
    kernel1 = _make_conv_stats_kernel(Cin, Cout, th, W)
    y_flat, stats = pl.pallas_call(
        kernel1,
        out_shape=(
            jax.ShapeDtypeStruct((N, Cout, H * W), jnp.float32),
            jax.ShapeDtypeStruct((N, Cout, 2), jnp.float32),
        ),
        grid_spec=pltpu.PrefetchScalarGridSpec(
            num_scalar_prefetch=0,
            grid=(N, num_j),
            in_specs=[
                pl.BlockSpec((None, None, Cin, SLAB), lambda n, j: (n, j, 0, 0)),
                pl.BlockSpec((9, Cout, Cin), lambda n, j: (0, 0, 0)),
            ],
            out_specs=[
                pl.BlockSpec((None, Cout, TM), lambda n, j: (n, 0, j)),
                pl.BlockSpec((None, Cout, 2), lambda n, j: (n, 0, 0)),
            ],
            scratch_shapes=[
                pltpu.VMEM((Cout, 1), jnp.float32),   # running per-channel sum
                pltpu.VMEM((Cout, 1), jnp.float32),   # running per-channel sumsq
            ],
        ),
        compiler_params=pltpu.CompilerParams(
            # Batch axis parallel (v7x megacore); row-block axis carries the
            # resident per-image stats accumulator -> arbitrary.
            dimension_semantics=("parallel", "arbitrary"),
            vmem_limit_bytes=32 * 1024 * 1024,  # tile chooser budgets <= 8 MiB
        ),
    )(slabs, w_t)

    # --- tiny scalar glue: combine per-image partials -> BN scale/shift -----
    m_total = N * H * W
    sum_c = jnp.sum(stats[:, :, 0], axis=0)                    # (Cout,)
    sq_c = jnp.sum(stats[:, :, 1], axis=0)                     # (Cout,)
    mean = sum_c / m_total
    var = jnp.maximum(sq_c / m_total - mean * mean, 0.0)       # clamp cancellation
    scale = gamma.astype(jnp.float32) * jax.lax.rsqrt(var + eps)
    shift = beta.astype(jnp.float32) - mean * scale
    scale_mat = scale.reshape(Cout, 1)
    shift_mat = shift.reshape(Cout, 1)

    # --- Pallas kernel 2: normalize + ReLU (already NCHW-flat layout) -------
    out_flat = pl.pallas_call(
        bn_relu_kernel,
        out_shape=jax.ShapeDtypeStruct((N, Cout, H * W), jnp.float32),
        grid_spec=pltpu.PrefetchScalarGridSpec(
            num_scalar_prefetch=0,
            grid=(N, num_j),
            in_specs=[
                pl.BlockSpec((None, Cout, TM), lambda n, j: (n, 0, j)),
                pl.BlockSpec((Cout, 1), lambda n, j: (0, 0)),
                pl.BlockSpec((Cout, 1), lambda n, j: (0, 0)),
            ],
            out_specs=pl.BlockSpec((None, Cout, TM), lambda n, j: (n, 0, j)),
        ),
        compiler_params=pltpu.CompilerParams(
            dimension_semantics=("parallel", "parallel"),
            vmem_limit_bytes=32 * 1024 * 1024),
    )(y_flat, scale_mat, shift_mat)

    # metadata-only reshape back to NCHW (no transpose pass)
    return out_flat.reshape(N, Cout, H, W)


# ---------------------------------------------------------------------------
# Pure-JAX reference (for verification)
# ---------------------------------------------------------------------------
def conv_block_reference(x, w, b, gamma, beta, eps=1e-5):
    y = jax.lax.conv_general_dilated(
        x, w, window_strides=(1, 1), padding="SAME",
        dimension_numbers=("NCHW", "OIHW", "NCHW"))
    y = y + b[None, :, None, None]
    mean = y.mean(axis=(0, 2, 3))
    var = y.var(axis=(0, 2, 3))  # biased
    y = (y - mean[None, :, None, None]) * jax.lax.rsqrt(var + eps)[None, :, None, None]
    y = y * gamma[None, :, None, None] + beta[None, :, None, None]
    return jnp.maximum(y, 0.0)


if __name__ == "__main__":
    # small shapes consistent with the module
    N, Cin, Cout, H, W = 2, 4, 8, 16, 16

    key = jax.random.PRNGKey(0)
    kx, kw, kb = jax.random.split(key, 3)

    x = jax.random.normal(kx, (N, Cin, H, W), dtype=jnp.float32)
    # deterministic parameter init (synthetic; not a checkpoint load)
    fan_in = Cin * 3 * 3
    bound = 1.0 / (fan_in ** 0.5)
    w = jax.random.uniform(kw, (Cout, Cin, 3, 3), jnp.float32, -bound, bound)
    b = jax.random.uniform(kb, (Cout,), jnp.float32, -bound, bound)
    gamma = jnp.ones((Cout,), jnp.float32)   # BatchNorm2d default weight
    beta = jnp.zeros((Cout,), jnp.float32)   # BatchNorm2d default bias

    fwd = jax.jit(conv_block_forward)
    out = fwd(x, w, b, gamma, beta)
    out = jax.block_until_ready(out)

    ref = conv_block_reference(x, w, b, gamma, beta)
    assert out.shape == (N, Cout, H, W)
    err = jnp.max(jnp.abs(out - ref))
    assert jnp.allclose(out, ref, atol=1e-4, rtol=1e-4), f"max err {err}"

    print("KERNEL_OK")
</pallas_src>

<mosaic_0001>
module attributes {stable_mosaic.version = 11 : i64} {
  func.func @kernel(%arg0: i32, %arg1: i32, %arg2: memref<1x1x4x320xf32, #tpu.memory_space<vmem>>, %arg3: memref<9x8x4xf32, #tpu.memory_space<vmem>>, %arg4: memref<1x8x256xf32, #tpu.memory_space<vmem>>, %arg5: memref<1x8x2xf32, #tpu.memory_space<vmem>>, %arg6: memref<8x1xf32, #tpu.memory_space<vmem>>, %arg7: memref<8x1xf32, #tpu.memory_space<vmem>>) attributes {dimension_semantics = [#tpu.dimension_semantics<parallel>, #tpu.dimension_semantics<arbitrary>], iteration_bounds = array<i64: 2, 1>, scalar_prefetch = 0 : i64, scratch_operands = 2 : i64, tpu.core_type = #tpu.core_type<tc>, window_params = [{transform_indices = @transform_0, window_bounds = array<i64: 1, 1, 4, 320>}, {pipeline_mode = #tpu.pipeline_mode<synchronous>, transform_indices = @transform_1, window_bounds = array<i64: 9, 8, 4>}, {transform_indices = @transform_2, window_bounds = array<i64: 1, 8, 256>}, {transform_indices = @transform_3, window_bounds = array<i64: 1, 8, 2>}]} {
    %c0_i32 = arith.constant 0 : i32
    %0 = arith.cmpi eq, %arg1, %c0_i32 : i32
    %1 = arith.extui %0 : i1 to i32
    %c0_i32_0 = arith.constant 0 : i32
    %2 = arith.cmpi ne, %1, %c0_i32_0 : i32
    scf.if %2 {
      %cst_58 = arith.constant 0.000000e+00 : f32
      %113 = vector.broadcast %cst_58 : f32 to vector<8x1xf32>
      %c0_59 = arith.constant 0 : index
      %c0_60 = arith.constant 0 : index
      %114 = vector.load %arg6[%c0_59, %c0_60] : memref<8x1xf32, #tpu.memory_space<vmem>>, vector<8x1xf32>
      tpu.vector_store %arg6[%c0_59, %c0_60], %113 {strides = array<i32>} : memref<8x1xf32, #tpu.memory_space<vmem>>, vector<8x1xf32>,
      %cst_61 = arith.constant 0.000000e+00 : f32
      %115 = vector.broadcast %cst_61 : f32 to vector<8x1xf32>
      %c0_62 = arith.constant 0 : index
      %c0_63 = arith.constant 0 : index
      %116 = vector.load %arg7[%c0_62, %c0_63] : memref<8x1xf32, #tpu.memory_space<vmem>>, vector<8x1xf32>
      tpu.vector_store %arg7[%c0_62, %c0_63], %115 {strides = array<i32>} : memref<8x1xf32, #tpu.memory_space<vmem>>, vector<8x1xf32>,
    } else {
    }
    %c0 = arith.constant 0 : index
    %c0_1 = arith.constant 0 : index
    %c0_2 = arith.constant 0 : index
    %c0_3 = arith.constant 0 : index
    %3 = vector.load %arg2[%c0, %c0_1, %c0_2, %c0_3] : memref<1x1x4x320xf32, #tpu.memory_space<vmem>>, vector<1x1x4x320xf32>
    %4 = vector.shape_cast %3 : vector<1x1x4x320xf32> to vector<4x320xf32>
    %5 = tpu.iota {dimensions = array<i32: 1>} : vector<1x256xi32>
    %c16_i32 = arith.constant 16 : i32
    %c0_i32_4 = arith.constant 0 : i32
    %6 = arith.cmpi eq, %c16_i32, %c0_i32_4 : i32
    %c1_i32 = arith.constant 1 : i32
    %7 = arith.select %6, %c1_i32, %c16_i32 : i32
    %8 = vector.broadcast %7 : i32 to vector<1x256xi32>
    %9 = arith.remsi %5, %8 : vector<1x256xi32>
    %c0_i32_5 = arith.constant 0 : i32
    %10 = vector.broadcast %c0_i32_5 : i32 to vector<1x256xi32>
    %11 = arith.cmpi ne, %9, %10 : vector<1x256xi32>
    %c0_i32_6 = arith.constant 0 : i32
    %12 = vector.broadcast %c0_i32_6 : i32 to vector<1x256xi32>
    %13 = arith.cmpi slt, %9, %12 : vector<1x256xi32>
    %c0_i32_7 = arith.constant 0 : i32
    %14 = arith.cmpi slt, %7, %c0_i32_7 : i32
    %15 = vector.broadcast %14 : i1 to vector<1x256xi1>
    %16 = vector.broadcast %15 : vector<1x256xi1> to vector<1x256xi1>
    %17 = arith.xori %13, %16 : vector<1x256xi1>
    %18 = arith.andi %17, %11 : vector<1x256xi1>
    %19 = vector.broadcast %7 : i32 to vector<1x256xi32>
    %20 = arith.addi %9, %19 : vector<1x256xi32>
    %21 = arith.select %18, %20, %9 : vector<1x256xi1>, vector<1x256xi32>
    %c0_i32_8 = arith.constant 0 : i32
    %22 = vector.broadcast %c0_i32_8 : i32 to vector<1x256xi32>
    %23 = arith.cmpi ne, %21, %22 : vector<1x256xi32>
    %c15_i32 = arith.constant 15 : i32
    %24 = vector.broadcast %c15_i32 : i32 to vector<1x256xi32>
    %25 = arith.cmpi ne, %21, %24 : vector<1x256xi32>
    %cst = arith.constant 0.000000e+00 : f32
    %26 = vector.broadcast %cst : f32 to vector<8x256xf32>
    %27 = vector.extract_strided_slice %4 {offsets = [0, 15], sizes = [4, 256], strides = [1, 1]} : vector<4x320xf32> to vector<4x256xf32>
    %cst_9 = arith.constant 0.000000e+00 : f32
    %28 = vector.shape_cast %23 : vector<1x256xi1> to vector<1x256xi1>
    %29 = vector.broadcast %28 : vector<1x256xi1> to vector<4x256xi1>
    %30 = vector.broadcast %cst_9 : f32 to vector<4x256xf32>
    %31 = arith.select %29, %27, %30 : vector<4x256xi1>, vector<4x256xf32>
    %c0_10 = arith.constant 0 : index
    %c0_11 = arith.constant 0 : index
    %c0_12 = arith.constant 0 : index
    %32 = vector.load %arg3[%c0_10, %c0_11, %c0_12] : memref<9x8x4xf32, #tpu.memory_space<vmem>>, vector<1x8x4xf32>
    %33 = vector.shape_cast %32 : vector<1x8x4xf32> to vector<8x4xf32>
    %cst_13 = arith.constant dense<0.000000e+00> : vector<8x256xf32>
    %34 = tpu.matmul %33, %31, %cst_13 {dimension_numbers = #tpu.dot_dimension_numbers<[1], [0], [0], [1], [0, 0, 1, 1], [], []>} : vector<8x4xf32>, vector<4x256xf32>, vector<8x256xf32> -> vector<8x256xf32>
    %35 = arith.addf %26, %34 : vector<8x256xf32>
    %36 = vector.extract_strided_slice %4 {offsets = [0, 16], sizes = [4, 256], strides = [1, 1]} : vector<4x320xf32> to vector<4x256xf32>
    %c1 = arith.constant 1 : index
    %c0_14 = arith.constant 0 : index
    %c0_15 = arith.constant 0 : index
    %37 = vector.load %arg3[%c1, %c0_14, %c0_15] : memref<9x8x4xf32, #tpu.memory_space<vmem>>, vector<1x8x4xf32>
    %38 = vector.shape_cast %37 : vector<1x8x4xf32> to vector<8x4xf32>
    %cst_16 = arith.constant dense<0.000000e+00> : vector<8x256xf32>
    %39 = tpu.matmul %38, %36, %cst_16 {dimension_numbers = #tpu.dot_dimension_numbers<[1], [0], [0], [1], [0, 0, 1, 1], [], []>} : vector<8x4xf32>, vector<4x256xf32>, vector<8x256xf32> -> vector<8x256xf32>
    %40 = arith.addf %35, %39 : vector<8x256xf32>
    %41 = vector.extract_strided_slice %4 {offsets = [0, 17], sizes = [4, 256], strides = [1, 1]} : vector<4x320xf32> to vector<4x256xf32>
    %cst_17 = arith.constant 0.000000e+00 : f32
    %42 = vector.shape_cast %25 : vector<1x256xi1> to vector<1x256xi1>
    %43 = vector.broadcast %42 : vector<1x256xi1> to vector<4x256xi1>
    %44 = vector.broadcast %cst_17 : f32 to vector<4x256xf32>
    %45 = arith.select %43, %41, %44 : vector<4x256xi1>, vector<4x256xf32>
    %c2 = arith.constant 2 : index
    %c0_18 = arith.constant 0 : index
    %c0_19 = arith.constant 0 : index
    %46 = vector.load %arg3[%c2, %c0_18, %c0_19] : memref<9x8x4xf32, #tpu.memory_space<vmem>>, vector<1x8x4xf32>
    %47 = vector.shape_cast %46 : vector<1x8x4xf32> to vector<8x4xf32>
    %cst_20 = arith.constant dense<0.000000e+00> : vector<8x256xf32>
    %48 = tpu.matmul %47, %45, %cst_20 {dimension_numbers = #tpu.dot_dimension_numbers<[1], [0], [0], [1], [0, 0, 1, 1], [], []>} : vector<8x4xf32>, vector<4x256xf32>, vector<8x256xf32> -> vector<8x256xf32>
    %49 = arith.addf %40, %48 : vector<8x256xf32>
    %50 = vector.extract_strided_slice %4 {offsets = [0, 31], sizes = [4, 256], strides = [1, 1]} : vector<4x320xf32> to vector<4x256xf32>
    %cst_21 = arith.constant 0.000000e+00 : f32
    %51 = vector.shape_cast %23 : vector<1x256xi1> to vector<1x256xi1>
    %52 = vector.broadcast %51 : vector<1x256xi1> to vector<4x256xi1>
    %53 = vector.broadcast %cst_21 : f32 to vector<4x256xf32>
    %54 = arith.select %52, %50, %53 : vector<4x256xi1>, vector<4x256xf32>
    %c3 = arith.constant 3 : index
    %c0_22 = arith.constant 0 : index
    %c0_23 = arith.constant 0 : index
    %55 = vector.load %arg3[%c3, %c0_22, %c0_23] : memref<9x8x4xf32, #tpu.memory_space<vmem>>, vector<1x8x4xf32>
    %56 = vector.shape_cast %55 : vector<1x8x4xf32> to vector<8x4xf32>
    %cst_24 = arith.constant dense<0.000000e+00> : vector<8x256xf32>
    %57 = tpu.matmul %56, %54, %cst_24 {dimension_numbers = #tpu.dot_dimension_numbers<[1], [0], [0], [1], [0, 0, 1, 1], [], []>} : vector<8x4xf32>, vector<4x256xf32>, vector<8x256xf32> -> vector<8x256xf32>
    %58 = arith.addf %49, %57 : vector<8x256xf32>
    %59 = vector.extract_strided_slice %4 {offsets = [0, 32], sizes = [4, 256], strides = [1, 1]} : vector<4x320xf32> to vector<4x256xf32>
    %c4 = arith.constant 4 : index
    %c0_25 = arith.constant 0 : index
    %c0_26 = arith.constant 0 : index
    %60 = vector.load %arg3[%c4, %c0_25, %c0_26] : memref<9x8x4xf32, #tpu.memory_space<vmem>>, vector<1x8x4xf32>
    %61 = vector.shape_cast %60 : vector<1x8x4xf32> to vector<8x4xf32>
    %cst_27 = arith.constant dense<0.000000e+00> : vector<8x256xf32>
    %62 = tpu.matmul %61, %59, %cst_27 {dimension_numbers = #tpu.dot_dimension_numbers<[1], [0], [0], [1], [0, 0, 1, 1], [], []>} : vector<8x4xf32>, vector<4x256xf32>, vector<8x256xf32> -> vector<8x256xf32>
    %63 = arith.addf %58, %62 : vector<8x256xf32>
    %64 = vector.extract_strided_slice %4 {offsets = [0, 33], sizes = [4, 256], strides = [1, 1]} : vector<4x320xf32> to vector<4x256xf32>
    %cst_28 = arith.constant 0.000000e+00 : f32
    %65 = vector.shape_cast %25 : vector<1x256xi1> to vector<1x256xi1>
    %66 = vector.broadcast %65 : vector<1x256xi1> to vector<4x256xi1>
    %67 = vector.broadcast %cst_28 : f32 to vector<4x256xf32>
    %68 = arith.select %66, %64, %67 : vector<4x256xi1>, vector<4x256xf32>
    %c5 = arith.constant 5 : index
    %c0_29 = arith.constant 0 : index
    %c0_30 = arith.constant 0 : index
    %69 = vector.load %arg3[%c5, %c0_29, %c0_30] : memref<9x8x4xf32, #tpu.memory_space<vmem>>, vector<1x8x4xf32>
    %70 = vector.shape_cast %69 : vector<1x8x4xf32> to vector<8x4xf32>
    %cst_31 = arith.constant dense<0.000000e+00> : vector<8x256xf32>
    %71 = tpu.matmul %70, %68, %cst_31 {dimension_numbers = #tpu.dot_dimension_numbers<[1], [0], [0], [1], [0, 0, 1, 1], [], []>} : vector<8x4xf32>, vector<4x256xf32>, vector<8x256xf32> -> vector<8x256xf32>
    %72 = arith.addf %63, %71 : vector<8x256xf32>
    %73 = vector.extract_strided_slice %4 {offsets = [0, 47], sizes = [4, 256], strides = [1, 1]} : vector<4x320xf32> to vector<4x256xf32>
    %cst_32 = arith.constant 0.000000e+00 : f32
    %74 = vector.shape_cast %23 : vector<1x256xi1> to vector<1x256xi1>
    %75 = vector.broadcast %74 : vector<1x256xi1> to vector<4x256xi1>
    %76 = vector.broadcast %cst_32 : f32 to vector<4x256xf32>
    %77 = arith.select %75, %73, %76 : vector<4x256xi1>, vector<4x256xf32>
    %c6 = arith.constant 6 : index
    %c0_33 = arith.constant 0 : index
    %c0_34 = arith.constant 0 : index
    %78 = vector.load %arg3[%c6, %c0_33, %c0_34] : memref<9x8x4xf32, #tpu.memory_space<vmem>>, vector<1x8x4xf32>
    %79 = vector.shape_cast %78 : vector<1x8x4xf32> to vector<8x4xf32>
    %cst_35 = arith.constant dense<0.000000e+00> : vector<8x256xf32>
    %80 = tpu.matmul %79, %77, %cst_35 {dimension_numbers = #tpu.dot_dimension_numbers<[1], [0], [0], [1], [0, 0, 1, 1], [], []>} : vector<8x4xf32>, vector<4x256xf32>, vector<8x256xf32> -> vector<8x256xf32>
    %81 = arith.addf %72, %80 : vector<8x256xf32>
    %82 = vector.extract_strided_slice %4 {offsets = [0, 48], sizes = [4, 256], strides = [1, 1]} : vector<4x320xf32> to vector<4x256xf32>
    %c7 = arith.constant 7 : index
    %c0_36 = arith.constant 0 : index
    %c0_37 = arith.constant 0 : index
    %83 = vector.load %arg3[%c7, %c0_36, %c0_37] : memref<9x8x4xf32, #tpu.memory_space<vmem>>, vector<1x8x4xf32>
    %84 = vector.shape_cast %83 : vector<1x8x4xf32> to vector<8x4xf32>
    %cst_38 = arith.constant dense<0.000000e+00> : vector<8x256xf32>
    %85 = tpu.matmul %84, %82, %cst_38 {dimension_numbers = #tpu.dot_dimension_numbers<[1], [0], [0], [1], [0, 0, 1, 1], [], []>} : vector<8x4xf32>, vector<4x256xf32>, vector<8x256xf32> -> vector<8x256xf32>
    %86 = arith.addf %81, %85 : vector<8x256xf32>
    %87 = vector.extract_strided_slice %4 {offsets = [0, 49], sizes = [4, 256], strides = [1, 1]} : vector<4x320xf32> to vector<4x256xf32>
    %cst_39 = arith.constant 0.000000e+00 : f32
    %88 = vector.shape_cast %25 : vector<1x256xi1> to vector<1x256xi1>
    %89 = vector.broadcast %88 : vector<1x256xi1> to vector<4x256xi1>
    %90 = vector.broadcast %cst_39 : f32 to vector<4x256xf32>
    %91 = arith.select %89, %87, %90 : vector<4x256xi1>, vector<4x256xf32>
    %c8 = arith.constant 8 : index
    %c0_40 = arith.constant 0 : index
    %c0_41 = arith.constant 0 : index
    %92 = vector.load %arg3[%c8, %c0_40, %c0_41] : memref<9x8x4xf32, #tpu.memory_space<vmem>>, vector<1x8x4xf32>
    %93 = vector.shape_cast %92 : vector<1x8x4xf32> to vector<8x4xf32>
    %cst_42 = arith.constant dense<0.000000e+00> : vector<8x256xf32>
    %94 = tpu.matmul %93, %91, %cst_42 {dimension_numbers = #tpu.dot_dimension_numbers<[1], [0], [0], [1], [0, 0, 1, 1], [], []>} : vector<8x4xf32>, vector<4x256xf32>, vector<8x256xf32> -> vector<8x256xf32>
    %95 = arith.addf %86, %94 : vector<8x256xf32>
    %c0_43 = arith.constant 0 : index
    %c0_44 = arith.constant 0 : index
    %c0_45 = arith.constant 0 : index
    %96 = vector.load %arg4[%c0_43, %c0_44, %c0_45] : memref<1x8x256xf32, #tpu.memory_space<vmem>>, vector<1x8x256xf32>
    %97 = vector.shape_cast %96 : vector<1x8x256xf32> to vector<8x256xf32>
    %98 = vector.shape_cast %95 : vector<8x256xf32> to vector<1x8x256xf32>
    tpu.vector_store %arg4[%c0_43, %c0_44, %c0_45], %98 {strides = array<i32>} : memref<1x8x256xf32, #tpu.memory_space<vmem>>, vector<1x8x256xf32>,
    %c0_46 = arith.constant 0 : index
    %c0_47 = arith.constant 0 : index
    %99 = vector.load %arg6[%c0_46, %c0_47] : memref<8x1xf32, #tpu.memory_space<vmem>>, vector<8x1xf32>
    %cst_48 = arith.constant dense<0.000000e+00> : vector<8xf32>
    %100 = vector.multi_reduction <add>, %95, %cst_48 [1] : vector<8x256xf32> to vector<8xf32>
    %101 = vector.shape_cast %100 : vector<8xf32> to vector<8x1xf32>
    %102 = arith.addf %99, %101 : vector<8x1xf32>
    %c0_49 = arith.constant 0 : index
    %c0_50 = arith.constant 0 : index
    %103 = vector.load %arg6[%c0_49, %c0_50] : memref<8x1xf32, #tpu.memory_space<vmem>>, vector<8x1xf32>
    tpu.vector_store %arg6[%c0_49, %c0_50], %102 {strides = array<i32>} : memref<8x1xf32, #tpu.memory_space<vmem>>, vector<8x1xf32>,
    %c0_51 = arith.constant 0 : index
    %c0_52 = arith.constant 0 : index
    %104 = vector.load %arg7[%c0_51, %c0_52] : memref<8x1xf32, #tpu.memory_space<vmem>>, vector<8x1xf32>
    %105 = arith.mulf %95, %95 : vector<8x256xf32>
    %cst_53 = arith.constant dense<0.000000e+00> : vector<8xf32>
    %106 = vector.multi_reduction <add>, %105, %cst_53 [1] : vector<8x256xf32> to vector<8xf32>
    %107 = vector.shape_cast %106 : vector<8xf32> to vector<8x1xf32>
    %108 = arith.addf %104, %107 : vector<8x1xf32>
    %c0_54 = arith.constant 0 : index
    %c0_55 = arith.constant 0 : index
    %109 = vector.load %arg7[%c0_54, %c0_55] : memref<8x1xf32, #tpu.memory_space<vmem>>, vector<8x1xf32>
    tpu.vector_store %arg7[%c0_54, %c0_55], %108 {strides = array<i32>} : memref<8x1xf32, #tpu.memory_space<vmem>>, vector<8x1xf32>,
    %c0_i32_56 = arith.constant 0 : i32
    %110 = arith.cmpi eq, %arg1, %c0_i32_56 : i32
    %111 = arith.extui %110 : i1 to i32
    %c0_i32_57 = arith.constant 0 : i32
    %112 = arith.cmpi ne, %111, %c0_i32_57 : i32
    scf.if %112 {
      %c0_58 = arith.constant 0 : index
      %c0_59 = arith.constant 0 : index
      %113 = vector.load %arg6[%c0_58, %c0_59] : memref<8x1xf32, #tpu.memory_space<vmem>>, vector<8x1xf32>
      %c0_60 = arith.constant 0 : index
      %c0_61 = arith.constant 0 : index
      %c0_62 = arith.constant 0 : index
      %114 = vector.load %arg5[%c0_60, %c0_61, %c0_62] : memref<1x8x2xf32, #tpu.memory_space<vmem>>, vector<1x8x1xf32>
      %115 = vector.shape_cast %114 : vector<1x8x1xf32> to vector<8x1xf32>
      %116 = vector.shape_cast %113 : vector<8x1xf32> to vector<1x8x1xf32>
      tpu.vector_store %arg5[%c0_60, %c0_61, %c0_62], %116 {strides = array<i32>} : memref<1x8x2xf32, #tpu.memory_space<vmem>>, vector<1x8x1xf32>,
      %c0_63 = arith.constant 0 : index
      %c0_64 = arith.constant 0 : index
      %117 = vector.load %arg7[%c0_63, %c0_64] : memref<8x1xf32, #tpu.memory_space<vmem>>, vector<8x1xf32>
      %c0_65 = arith.constant 0 : index
      %c0_66 = arith.constant 0 : index
      %c1_67 = arith.constant 1 : index
      %118 = vector.load %arg5[%c0_65, %c0_66, %c1_67] : memref<1x8x2xf32, #tpu.memory_space<vmem>>, vector<1x8x1xf32>
      %119 = vector.shape_cast %118 : vector<1x8x1xf32> to vector<8x1xf32>
      %120 = vector.shape_cast %117 : vector<8x1xf32> to vector<1x8x1xf32>
      tpu.vector_store %arg5[%c0_65, %c0_66, %c1_67], %120 {strides = array<i32>} : memref<1x8x2xf32, #tpu.memory_space<vmem>>, vector<1x8x1xf32>,
    } else {
    }
    return
  }
  func.func @transform_0(%arg0: i32, %arg1: i32) -> (i32, i32, i32, i32) {
    %c0_i32 = arith.constant 0 : i32
    %c0_i32_0 = arith.constant 0 : i32
    %c0_i32_1 = arith.constant 0 : i32
    return %arg0, %arg1, %c0_i32, %c0_i32_0 : i32, i32, i32, i32
  }
  func.func @transform_1(%arg0: i32, %arg1: i32) -> (i32, i32, i32) {
    %c0_i32 = arith.constant 0 : i32
    %c0_i32_0 = arith.constant 0 : i32
    %c0_i32_1 = arith.constant 0 : i32
    %c0_i32_2 = arith.constant 0 : i32
    return %c0_i32, %c0_i32_0, %c0_i32_1 : i32, i32, i32
  }
  func.func @transform_2(%arg0: i32, %arg1: i32) -> (i32, i32, i32) {
    %c0_i32 = arith.constant 0 : i32
    %c0_i32_0 = arith.constant 0 : i32
    return %arg0, %c0_i32, %arg1 : i32, i32, i32
  }
  func.func @transform_3(%arg0: i32, %arg1: i32) -> (i32, i32, i32) {
    %c0_i32 = arith.constant 0 : i32
    %c0_i32_0 = arith.constant 0 : i32
    %c0_i32_1 = arith.constant 0 : i32
    return %arg0, %c0_i32, %c0_i32_0 : i32, i32, i32
  }
}

module attributes {stable_mosaic.version = 11 : i64} {
  func.func @bn_relu_kernel(%arg0: i32, %arg1: i32, %arg2: memref<1x8x256xf32, #tpu.memory_space<vmem>>, %arg3: memref<8x1xf32, #tpu.memory_space<vmem>>, %arg4: memref<8x1xf32, #tpu.memory_space<vmem>>, %arg5: memref<1x8x256xf32, #tpu.memory_space<vmem>>) attributes {dimension_semantics = [#tpu.dimension_semantics<parallel>, #tpu.dimension_semantics<parallel>], iteration_bounds = array<i64: 2, 1>, scalar_prefetch = 0 : i64, scratch_operands = 0 : i64, tpu.core_type = #tpu.core_type<tc>, window_params = [{transform_indices = @transform_0, window_bounds = array<i64: 1, 8, 256>}, {pipeline_mode = #tpu.pipeline_mode<synchronous>, transform_indices = @transform_1, window_bounds = array<i64: 8, 1>}, {pipeline_mode = #tpu.pipeline_mode<synchronous>, transform_indices = @transform_2, window_bounds = array<i64: 8, 1>}, {transform_indices = @transform_3, window_bounds = array<i64: 1, 8, 256>}]} {
    %c0 = arith.constant 0 : index
    %c0_0 = arith.constant 0 : index
    %c0_1 = arith.constant 0 : index
    %0 = vector.load %arg2[%c0, %c0_0, %c0_1] : memref<1x8x256xf32, #tpu.memory_space<vmem>>, vector<1x8x256xf32>
    %1 = vector.shape_cast %0 : vector<1x8x256xf32> to vector<8x256xf32>
    %c0_2 = arith.constant 0 : index
    %c0_3 = arith.constant 0 : index
    %2 = vector.load %arg3[%c0_2, %c0_3] : memref<8x1xf32, #tpu.memory_space<vmem>>, vector<8x1xf32>
    %3 = vector.broadcast %2 : vector<8x1xf32> to vector<8x256xf32>
    %4 = arith.mulf %1, %3 : vector<8x256xf32>
    %c0_4 = arith.constant 0 : index
    %c0_5 = arith.constant 0 : index
    %5 = vector.load %arg4[%c0_4, %c0_5] : memref<8x1xf32, #tpu.memory_space<vmem>>, vector<8x1xf32>
    %6 = vector.broadcast %5 : vector<8x1xf32> to vector<8x256xf32>
    %7 = arith.addf %4, %6 : vector<8x256xf32>
    %cst = arith.constant 0.000000e+00 : f32
    %8 = vector.broadcast %cst : f32 to vector<8x256xf32>
    %9 = arith.maximumf %7, %8 : vector<8x256xf32>
    %c0_6 = arith.constant 0 : index
    %c0_7 = arith.constant 0 : index
    %c0_8 = arith.constant 0 : index
    %10 = vector.load %arg5[%c0_6, %c0_7, %c0_8] : memref<1x8x256xf32, #tpu.memory_space<vmem>>, vector<1x8x256xf32>
    %11 = vector.shape_cast %10 : vector<1x8x256xf32> to vector<8x256xf32>
    %12 = vector.shape_cast %9 : vector<8x256xf32> to vector<1x8x256xf32>
    tpu.vector_store %arg5[%c0_6, %c0_7, %c0_8], %12 {strides = array<i32>} : memref<1x8x256xf32, #tpu.memory_space<vmem>>, vector<1x8x256xf32>,
    return
  }
  func.func @transform_0(%arg0: i32, %arg1: i32) -> (i32, i32, i32) {
    %c0_i32 = arith.constant 0 : i32
    %c0_i32_0 = arith.constant 0 : i32
    return %arg0, %c0_i32, %arg1 : i32, i32, i32
  }
  func.func @transform_1(%arg0: i32, %arg1: i32) -> (i32, i32) {
    %c0_i32 = arith.constant 0 : i32
    %c0_i32_0 = arith.constant 0 : i32
    %c0_i32_1 = arith.constant 0 : i32
    return %c0_i32, %c0_i32_0 : i32, i32
  }
  func.func @transform_2(%arg0: i32, %arg1: i32) -> (i32, i32) {
    %c0_i32 = arith.constant 0 : i32
    %c0_i32_0 = arith.constant 0 : i32
    %c0_i32_1 = arith.constant 0 : i32
    return %c0_i32, %c0_i32_0 : i32, i32
  }
  func.func @transform_3(%arg0: i32, %arg1: i32) -> (i32, i32, i32) {
    %c0_i32 = arith.constant 0 : i32
    %c0_i32_0 = arith.constant 0 : i32
    return %arg0, %c0_i32, %arg1 : i32, i32, i32
  }
}

</mosaic_0001>

<bundles_post_ra>
// kernel: conv_block_forward.3
= control target key start
LH: loop header
LB: loop body
LE: loop exit
PB: predicated region body
PF: predicated region fallthrough
CT: control target
= control target key end

     0   :  { %s403_s12 = smov 0   ;;  %s405_s13 = smov 0   ;;  %s442_s0 = inlined_call_operand.vmem [shape: f32[2,8,256], index: 0, kind: input, shape index: {}]   ;;  %s443_s1 = inlined_call_operand.vmem [shape: f32[8,1], index: 1, kind: input, shape index: {}]   ;;  %s444_s2 = inlined_call_operand.vmem [shape: f32[8,1], index: 2, kind: input, shape index: {}]   ;;  %s445_s3 = inlined_call_operand.vmem [shape: f32[2,8,256], index: 3, kind: output, shape index: {}]  }
   0x1   :  { %s407_s14 = smov 0  }
   0x2 LB: > { %s25_s15 = sadd.s32 1, %s376_s13  ;;  %p323_p0 = scmp.ge.s32.totalorder %s380_s14, 1  ;;  %s380_s14 = sphi %s407_s14, %s13_s14   ;;  %s376_s13 = sphi %s405_s13, %s447_s13   ;;  %s372_s12 = sphi %s403_s12, %s446_s12  }
   0x3   : > { %p27_p1 = scmp.ge.s32.totalorder %s25_s15, 2  ;;  %p158_p2 = scmp.lt.s32.totalorder %s380_s14, 3 }
   0x5   : > { %s449_s15 = smov (%p27_p1, %s25_s15), 0  ;;  %p159_p3 = pnand %p323_p0, %p158_p2 }
   0x6   : > { %p191_p4 = scmp.lt.s32.totalorder (!%p159_p3), %s372_s12, 1 }
   0x7   : > { %162 = sbr.rel (%p159_p3) target bundleno = 147 (0x93), region = 32 }
   0xc   : > { %v212_v0 = vld [vmem:[%s443_s1] sm:$0xff]  ;;  %v382_v1 = vmov 0   ;;  %s451_s12 = smov (!%p191_p4, %s372_s12), 1 }
   0xd   : > { %357 = vset.pattern.permute.xlu0 %v382_v1  ;;  %v220_v2 = vld [vmem:[%s444_s2] sm:$0xff]  ;;  %s330_s20 = sshll.u32 %s451_s12, 4 }
   0xe   : > { %215 = vperm.xlu0 %357, %v212_v0   ;;  %s198_s23 = scalar_lea.vmem %s442_s0, %s330_s20  ;;  %s208_s26 = scalar_lea.vmem %s445_s3, %s330_s20 }
   0xf   : > { %v210_v4 = vld [vmem:[%s198_s23] sm:$0xff]  ;;  %v211_v5 = vld [vmem:[%s198_s23 + $0x8] sm:$0xff] }
  0x12   : > { %223 = vperm.xlu0 %357, %v220_v2  }
  0x89   : > { %v216_v3 = vpop.permute.xlu0 %215 }
  0x8a   : > { %v218_v6 = vmul.f32 %v216_v3, %v210_v4  ;;  %v219_v7 = vmul.f32 %v216_v3, %v211_v5 }
  0x8d   : > { %v224_v8 = vpop.permute.xlu0 %223 }
  0x8e   : > { %v226_v9 = vadd.f32 %v224_v8, %v218_v6  ;;  %v227_v10 = vadd.f32 %v224_v8, %v219_v7 }
  0x90   : > { %v228_v11 = vmax.f32 %v226_v9, 0.0  ;;  %v229_v12 = vmax.f32 %v227_v10, 0.0 }
  0x92   : > { %230 = vst [vmem:[%s208_s26] sm:$0xff] %v228_v11  ;;  %231 = vst [vmem:[%s208_s26 + $0x8] sm:$0xff] %v229_v12 }
  0x93 PF: > { %s13_s14 = sadd.s32 1, %s380_s14   ;;  %s446_s12 = smov %s376_s13 }
  0x94   : > { %p10_p5 = scmp.ge.s32.totalorder %s13_s14, 4   ;;  %s447_s13 = smov %s449_s15 }
  0x96   :  { %12 = sbr.rel (!%p10_p5) target bundleno = 2 (0x2), region = 62 }

// kernel: conv_block_forward.2
= control target key start
LH: loop header
LB: loop body
LE: loop exit
PB: predicated region body
PF: predicated region fallthrough
CT: control target
= control target key end

     0   :  { %s1411_s12 = smov 0   ;;  %s1413_s13 = smov 0   ;;  %s1564_s0 = inlined_call_operand.vmem [shape: f32[2,1,4,320], index: 0, kind: input, shape index: {}]   ;;  %s1565_s1 = inlined_call_operand.vmem [shape: f32[9,8,4], index: 1, kind: input, shape index: {}]   ;;  %s1566_s2 = inlined_call_operand.vmem [shape: f32[2,8,256], index: 2, kind: output, shape index: {0}]   ;;  %s1567_s3 = inlined_call_operand.vmem [shape: f32[2,8,2], index: 3, kind: output, shape index: {1}]  }
   0x1   :  { %s1415_s14 = smov 0  }
   0x2 LB: > { %s26_s15 = sadd.s32 1, %s1374_s13  ;;  %p1276_p0 = scmp.ge.s32.totalorder %s1378_s14, 1  ;;  %s1378_s14 = sphi %s1415_s14, %s14_s14   ;;  %s1374_s13 = sphi %s1413_s13, %s1577_s13   ;;  %s1370_s12 = sphi %s1411_s12, %s1576_s12  }
   0x3   : > { %p28_p1 = scmp.ge.s32.totalorder %s26_s15, 2  ;;  %p160_p2 = scmp.lt.s32.totalorder %s1378_s14, 3 }
   0x5   : > { %s1579_s15 = smov (%p28_p1, %s26_s15), 0  ;;  %p161_p3 = pnand %p1276_p0, %p160_p2 }
   0x6   : > { %p196_p4 = scmp.lt.s32.totalorder (!%p161_p3), %s1370_s12, 1  ;;  %s1380_s20 = smov (!%p161_p3), 113  }
   0x7   : > { %164 = sbr.rel (%p161_p3) target bundleno = 652 (0x28c), region = 28  ;;  %s1381_s21 = smov (!%p161_p3), 112  }
   0x8   : > { %s1383_s22 = smov (!%p161_p3), 111   ;;  %s1384_s23 = smov (!%p161_p3), 97  }
   0x9   : > { %s1385_s24 = smov (!%p161_p3), 96   ;;  %s1386_s25 = smov (!%p161_p3), 95  }
   0xa   : > { %s1387_s26 = smov (!%p161_p3), 81   ;;  %s1388_s27 = smov (!%p161_p3), 80  }
   0xb   : > { %s1389_s28 = smov (!%p161_p3), 79   ;;  %s1390_s5 = smov (!%p161_p3), 1  }
   0xc   : > { %s1581_s12 = smov (!%p196_p4, %s1370_s12), 1  ;;  %v1382_v3 = vmov 0.0   ;;  %v228_v4 = vlaneseq  ;;  %vm272_vm0 = vcmask 924672   ;;  %vm288_vm1 = vcmask 916480   ;;  %v1281_v21 = vld [vmem:[%s1565_s1 + $0x8] sm:$0xff]  ;;  %v279_v24 = vld [vmem:[%s1565_s1] sm:$0xff] }
   0xd   : > { %s1319_s16 = smul.u32 12, %s1581_s12  ;;  %364 = vmatprep.mubr.f32.mxu0 %v1382_v3  ;;  %444 = vmatprep.mubr.f32.mxu1 %v1382_v3  ;;  %vm295_vm2 = vcmask 1043456   ;;  %vm291_vm5 = vcmask 31744   ;;  %vm461_vm6 = vcmask 908288   ;;  %v1288_v34 = vld [vmem:[%s1565_s1 + $0x10] sm:$0xff]  ;;  %vm558_vm9 = vcmask 793600  }
   0xe   : > { %v229_v5 = vand.u32 127, %v228_v4  ;;  %vm657_vm10 = vcmask 785408   ;;  %v1292_v42 = vld [vmem:[%s1565_s1 + $0x18] sm:$0xff]  ;;  %v1296_v48 = vld [vmem:[%s1565_s1 + $0x20] sm:$0xff]  ;;  %vm746_vm11 = vcmask 777216   ;;  %vm843_vm12 = vcmask 662528  }
   0xf   : > { %s204_s19 = scalar_lea.vmem %s1564_s0, %s1319_s16  ;;  %v1300_v56 = vld [vmem:[%s1565_s1 + $0x28] sm:$0xff]  ;;  %vm942_vm13 = vcmask 654336   ;;  %vm1031_vm14 = vcmask 646144   ;;  %v1312_v14 = vld [vmem:[%s1565_s1 + $0x40] sm:$0xff]  ;;  %vm223_vm15 = vcmask 7168  }
  0x10   : > { %v227_v0 = vld [vmem:[%s204_s19 + $0x8] sm:$0xf]  ;;  %v226_v1 = vld [vmem:[%s204_s19] sm:$0xff]  ;;  %v230_v6 = vadd.s32 128, %v229_v5  ;;  %v235_v10 = vand.u32 15, %v229_v5  ;;  %224 = vst.msk [vmem:[#allocation2] sm:$0xff] %vm223_vm15, %v1382_v3 }
  0x11   : > { %270 = vrot.lane.b32.xlu1 %v227_v0, %s1380_s20  ;;  %286 = vrot.lane.b32.xlu0 %v227_v0, %s1381_s21  ;;  %v265_v2 = vcombine.high %v226_v1, %v226_v1  ;;  %225 = vst.msk [vmem:[#allocation3] sm:$0xff] %vm223_vm15, %v1382_v3 }
  0x12   : > { %v242_v9 = vand.u32 15, %v230_v6  ;;  %vm1441_vm4 = vcmp.ne.s32.totalorder %v235_v10, 0  ;;  %vm1471_vm8 = vcmp.ne.s32.totalorder %v235_v10, 15 }
  0x14   : > { %vm1437_vm3 = vcmp.ne.s32.totalorder %v242_v9, 0  ;;  %vm1458_vm7 = vcmp.ne.s32.totalorder %v242_v9, 15 }
  0x15   : > { %266 = vrot.lane.b32.xlu1 %v226_v1, %s1380_s20  ;;  %282 = vrot.lane.b32.xlu0 %v226_v1, %s1381_s21 }
  0x19   : > { %268 = vrot.lane.b32.xlu1 %v265_v2, %s1380_s20  ;;  %284 = vrot.lane.b32.xlu0 %v265_v2, %s1381_s21 }
  0x1d   : > { %459 = vrot.lane.b32.xlu1 %v227_v0, %s1383_s22  ;;  %457 = vrot.lane.b32.xlu0 %v265_v2, %s1383_s22 }
  0x21   : > { %554 = vrot.lane.b32.xlu1 %v265_v2, %s1384_s23  ;;  %455 = vrot.lane.b32.xlu0 %v226_v1, %s1383_s22 }
  0x25   : > { %552 = vrot.lane.b32.xlu1 %v226_v1, %s1384_s23  ;;  %556 = vrot.lane.b32.xlu0 %v227_v0, %s1384_s23 }
  0x29   : > { %655 = vrot.lane.b32.xlu1 %v227_v0, %s1385_s24  ;;  %653 = vrot.lane.b32.xlu0 %v265_v2, %s1385_s24 }
  0x2d   : > { %742 = vrot.lane.b32.xlu1 %v265_v2, %s1386_s25  ;;  %651 = vrot.lane.b32.xlu0 %v226_v1, %s1385_s24  ;;  %s1318_s24 = sshll.u32 %s1581_s12, 4 }
  0x31   : > { %740 = vrot.lane.b32.xlu1 %v226_v1, %s1386_s25  ;;  %744 = vrot.lane.b32.xlu0 %v227_v0, %s1386_s25 }
  0x35   : > { %841 = vrot.lane.b32.xlu1 %v227_v0, %s1387_s26  ;;  %839 = vrot.lane.b32.xlu0 %v265_v2, %s1387_s26 }
  0x39   : > { %938 = vrot.lane.b32.xlu1 %v265_v2, %s1388_s27  ;;  %837 = vrot.lane.b32.xlu0 %v226_v1, %s1387_s26 }
  0x3d   : > { %936 = vrot.lane.b32.xlu1 %v226_v1, %s1388_s27  ;;  %940 = vrot.lane.b32.xlu0 %v227_v0, %s1388_s27  ;;  %s213_s27 = scalar_lea.vmem %s1566_s2, %s1318_s24 }
  0x41   : > { %1029 = vrot.lane.b32.xlu1 %v227_v0, %s1389_s28  ;;  %1027 = vrot.lane.b32.xlu0 %v265_v2, %s1389_s28  ;;  %v1304_v0 = vld [vmem:[%s1565_s1 + $0x30] sm:$0xff] }
  0x45   : > { %1025 = vrot.lane.b32.xlu0 %v226_v1, %s1389_s28  ;;  %s1280_s28 = sshll.u32 %s1581_s12, 3 }
  0x46   : > { %s218_s4 = scalar_lea.vmem %s1567_s3, %s1280_s28 }
  0x83   : > { %v271_v7 = vpop.permute.xlu1 %270  ;;  %v287_v8 = vpop.permute.xlu0 %286 }
  0x87   : > { %v267_v11 = vpop.permute.xlu1 %266  ;;  %v283_v12 = vpop.permute.xlu0 %282 }
  0x8b   : > { %v269_v15 = vpop.permute.xlu1 %268  ;;  %v285_v16 = vpop.permute.xlu0 %284 }
  0x8c   : > { %v273_v17 = vsel %vm272_vm0, %v267_v11, %v269_v15  ;;  %v290_v18 = vsel %vm288_vm1, %v285_v16, %v287_v8  ;;  %v289_v19 = vsel %vm288_vm1, %v283_v12, %v285_v16  ;;  %v274_v20 = vsel %vm272_vm0, %v269_v15, %v271_v7  ;;  %v1308_v7 = vld [vmem:[%s1565_s1 + $0x38] sm:$0xff] }
  0x8d   : > { %1282 = vmatprep.subr.msk.mxu0 %vm295_vm2, %v290_v18  ;;  %v278_v22 = vsel %vm1437_vm3, %v274_v20, 0.0  ;;  %v277_v23 = vsel %vm1441_vm4, %v273_v17, 0.0  ;;  %vm1149_vm0 = vcmask 15368  }
  0x8e   : > { %1283 = vmatpush1.msk.msra.mxu0 %vm295_vm2, %v289_v19  ;;  %1285 = vmatprep.subr.msk.mxu1 %vm295_vm2, %v278_v22 }
  0x8f   : > { %1286 = vmatpush1.msk.msra.mxu1 %vm295_vm2, %v277_v23  ;;  %v460_v26 = vpop.permute.xlu1 %459  ;;  %v458_v27 = vpop.permute.xlu0 %457  ;;  %1284 = vmatmul.mubr.msk.f32.vlgmr.msra.gmra.mxu0 %vm291_vm5, %v1281_v21 }
  0x90   : > { %v463_v28 = vsel %vm461_vm6, %v458_v27, %v460_v26  ;;  %1287 = vmatmul.mubr.msk.f32.vlgmr.msra.gmra.mxu1 %vm291_vm5, %v279_v24  ;;  %543 = vmatprep.mubr.f32.mxu0 %v1382_v3 }
  0x91   : > { %v467_v29 = vsel %vm1458_vm7, %v463_v28, 0.0  ;;  %640 = vmatprep.mubr.f32.mxu1 %v1382_v3 }
  0x92   : > { %1289 = vmatprep.subr.msk.mxu0 %vm295_vm2, %v467_v29 }
  0x93   : > { %v555_v31 = vpop.permute.xlu1 %554  ;;  %v456_v32 = vpop.permute.xlu0 %455 }
  0x94   : > { %v462_v33 = vsel %vm461_vm6, %v456_v32, %v458_v27 }
  0x95   : > { %v466_v35 = vsel %vm1471_vm8, %v462_v33, 0.0 }
  0x96   : > { %1290 = vmatpush1.msk.msra.mxu0 %vm295_vm2, %v466_v35 }
  0x97   : > { %v553_v36 = vpop.permute.xlu1 %552  ;;  %v557_v37 = vpop.permute.xlu0 %556  ;;  %1291 = vmatmul.mubr.msk.f32.vlgmr.msra.gmra.mxu0 %vm291_vm5, %v1288_v34 }
  0x98   : > { %v559_v38 = vsel %vm558_vm9, %v553_v36, %v555_v31  ;;  %v560_v39 = vsel %vm558_vm9, %v555_v31, %v557_v37  ;;  %731 = vmatprep.mubr.f32.mxu0 %v1382_v3 }
  0x99   : > { %v563_v40 = vsel %vm1441_vm4, %v559_v38, 0.0  ;;  %v564_v41 = vsel %vm1437_vm3, %v560_v39, 0.0 }
  0x9a   : > { %1293 = vmatprep.subr.msk.mxu1 %vm295_vm2, %v564_v41 }
  0x9b   : > { %v656_v43 = vpop.permute.xlu1 %655  ;;  %1294 = vmatpush1.msk.msra.mxu1 %vm295_vm2, %v563_v40  ;;  %v654_v44 = vpop.permute.xlu0 %653 }
  0x9c   : > { %v659_v45 = vsel %vm657_vm10, %v654_v44, %v656_v43  ;;  %1295 = vmatmul.mubr.msk.f32.vlgmr.msra.gmra.mxu1 %vm291_vm5, %v1292_v42 }
  0x9d   : > { %1297 = vmatprep.subr.msk.mxu0 %vm295_vm2, %v659_v45  ;;  %828 = vmatprep.mubr.f32.mxu1 %v1382_v3 }
  0x9f   : > { %v743_v46 = vpop.permute.xlu1 %742  ;;  %v652_v47 = vpop.permute.xlu0 %651 }
  0xa0   : > { %v658_v49 = vsel %vm657_vm10, %v652_v47, %v654_v44 }
  0xa1   : > { %1298 = vmatpush1.msk.msra.mxu0 %vm295_vm2, %v658_v49 }
  0xa2   : > { %1299 = vmatmul.mubr.msk.f32.vlgmr.msra.gmra.mxu0 %vm291_vm5, %v1296_v48 }
  0xa3   : > { %v741_v50 = vpop.permute.xlu1 %740  ;;  %v745_v51 = vpop.permute.xlu0 %744  ;;  %925 = vmatprep.mubr.f32.mxu0 %v1382_v3 }
  0xa4   : > { %v747_v52 = vsel %vm746_vm11, %v741_v50, %v743_v46  ;;  %v748_v53 = vsel %vm746_vm11, %v743_v46, %v745_v51 }
  0xa5   : > { %v751_v54 = vsel %vm1471_vm8, %v747_v52, 0.0  ;;  %v752_v55 = vsel %vm1458_vm7, %v748_v53, 0.0  ;;  %v1124_v53 = vld [vmem:[#allocation2] sm:$0xff] }
  0xa6   : > { %1301 = vmatprep.subr.msk.mxu1 %vm295_vm2, %v752_v55  ;;  %v1131_v55 = vld [vmem:[#allocation3] sm:$0xff] }
  0xa7   : > { %v842_v57 = vpop.permute.xlu1 %841  ;;  %1302 = vmatpush1.msk.msra.mxu1 %vm295_vm2, %v751_v54  ;;  %v840_v58 = vpop.permute.xlu0 %839 }
  0xa8   : > { %v845_v59 = vsel %vm843_vm12, %v840_v58, %v842_v57  ;;  %1303 = vmatmul.mubr.msk.f32.vlgmr.msra.gmra.mxu1 %vm291_vm5, %v1300_v56 }
  0xa9   : > { %v849_v60 = vsel %vm1437_vm3, %v845_v59, 0.0  ;;  %1016 = vmatprep.mubr.f32.mxu1 %v1382_v3 }
  0xaa   : > { %1305 = vmatprep.subr.msk.mxu0 %vm295_vm2, %v849_v60 }
  0xab   : > { %v939_v61 = vpop.permute.xlu1 %938  ;;  %v838_v62 = vpop.permute.xlu0 %837 }
  0xac   : > { %v844_v63 = vsel %vm843_vm12, %v838_v62, %v840_v58 }
  0xad   : > { %v848_v1 = vsel %vm1441_vm4, %v844_v63, 0.0 }
  0xae   : > { %1306 = vmatpush1.msk.msra.mxu0 %vm295_vm2, %v848_v1 }
  0xaf   : > { %v937_v2 = vpop.permute.xlu1 %936  ;;  %v941_v4 = vpop.permute.xlu0 %940  ;;  %1307 = vmatmul.mubr.msk.f32.vlgmr.msra.gmra.mxu0 %vm291_vm5, %v1304_v0 }
  0xb0   : > { %v943_v5 = vsel %vm942_vm13, %v937_v2, %v939_v61  ;;  %v944_v6 = vsel %vm942_vm13, %v939_v61, %v941_v4  ;;  %1113 = vmatprep.mubr.f32.mxu0 %v1382_v3 }
  0xb1   : > { %1309 = vmatprep.subr.msk.mxu1 %vm295_vm2, %v944_v6 }
  0xb2   : > { %1310 = vmatpush1.msk.msra.mxu1 %vm295_vm2, %v943_v5 }
  0xb3   : > { %v1030_v8 = vpop.permute.xlu1 %1029  ;;  %v1028_v9 = vpop.permute.xlu0 %1027  ;;  %1311 = vmatmul.mubr.msk.f32.vlgmr.msra.gmra.mxu1 %vm291_vm5, %v1308_v7 }
  0xb4   : > { %v1033_v10 = vsel %vm1031_vm14, %v1028_v9, %v1030_v8 }
  0xb5   : > { %v1037_v11 = vsel %vm1458_vm7, %v1033_v10, 0.0 }
  0xb6   : > { %1313 = vmatprep.subr.msk.mxu0 %vm295_vm2, %v1037_v11 }
  0xb7   : > { %v1026_v12 = vpop.permute.xlu0 %1025 }
  0xb8   : > { %v1032_v13 = vsel %vm1031_vm14, %v1026_v12, %v1028_v9 }
  0xb9   : > { %v1036_v15 = vsel %vm1471_vm8, %v1032_v13, 0.0 }
  0xba   : > { %1314 = vmatpush1.msk.msra.mxu0 %vm295_vm2, %v1036_v15 }
  0xbb   : > { %1315 = vmatmul.mubr.msk.f32.vlgmr.msra.gmra.mxu0 %vm291_vm5, %v1312_v14 }
 0x14f   : > { %v366_v16 = vpop.f32.mrf.mxu0 }
 0x150   : > { %v446_v18 = vpop.f32.mrf.mxu1 }
 0x151   : > { %v368_v17 = vpop.f32.mrf.mxu0  ;;  %v447_v21 = vadd.f32 %v446_v18, %v366_v16 }
 0x152   : > { %v448_v19 = vpop.f32.mrf.mxu1 }
 0x153   : > { %v449_v22 = vadd.f32 %v448_v19, %v368_v17 }
 0x157   : > { %v545_v20 = vpop.f32.mrf.mxu0 }
 0x158   : > { %v550_v25 = vadd.f32 %v545_v20, %v447_v21 }
 0x159   : > { %v547_v23 = vpop.f32.mrf.mxu0 }
 0x15a   : > { %v551_v26 = vadd.f32 %v547_v23, %v449_v22 }
 0x15c   : > { %v642_v24 = vpop.f32.mrf.mxu1 }
 0x15d   : > { %v647_v29 = vadd.f32 %v642_v24, %v550_v25 }
 0x15e   : > { %v644_v27 = vpop.f32.mrf.mxu1 }
 0x15f   : > { %v648_v30 = vadd.f32 %v644_v27, %v551_v26 }
 0x162   : > { %v733_v28 = vpop.f32.mrf.mxu0 }
 0x163   : > { %v738_v33 = vadd.f32 %v733_v28, %v647_v29 }
 0x164   : > { %v735_v31 = vpop.f32.mrf.mxu0 }
 0x165   : > { %v739_v3 = vadd.f32 %v735_v31, %v648_v30 }
 0x168   : > { %v830_v32 = vpop.f32.mrf.mxu1 }
 0x169   : > { %v835_v36 = vadd.f32 %v830_v32, %v738_v33 }
 0x16a   : > { %v832_v34 = vpop.f32.mrf.mxu1 }
 0x16b   : > { %v836_v37 = vadd.f32 %v832_v34, %v739_v3 }
 0x16f   : > { %v927_v35 = vpop.f32.mrf.mxu0 }
 0x170   : > { %v932_v40 = vadd.f32 %v927_v35, %v835_v36 }
 0x171   : > { %v929_v38 = vpop.f32.mrf.mxu0 }
 0x172   : > { %v933_v41 = vadd.f32 %v929_v38, %v836_v37 }
 0x173   : > { %v1018_v39 = vpop.f32.mrf.mxu1 }
 0x174   : > { %v1023_v43 = vadd.f32 %v1018_v39, %v932_v40 }
 0x175   : > { %v1020_v42 = vpop.f32.mrf.mxu1 }
 0x176   : > { %v1024_v45 = vadd.f32 %v1020_v42, %v933_v41 }
 0x17b   : > { %v1115_v44 = vpop.f32.mrf.mxu0 }
 0x17c   : > { %v1120_v46 = vadd.f32 %v1115_v44, %v1023_v43 }
 0x17d   : > { %v1117_v47 = vpop.f32.mrf.mxu0 }
 0x17e   : > { %1122 = vst [vmem:[%s213_s27] sm:$0xff] %v1120_v46  ;;  %v1121_v48 = vadd.f32 %v1117_v47, %v1024_v45  ;;  %v1132_v50 = vmul.f32 %v1120_v46, %v1120_v46 }
 0x180   : > { %1123 = vst [vmem:[%s213_s27 + $0x8] sm:$0xff] %v1121_v48  ;;  %v1125_v49 = vadd.f32 %v1121_v48, %v1120_v46  ;;  %v1133_v51 = vmul.f32 %v1121_v48, %v1121_v48 }
 0x182   : > { %1126 = vadd.xlane.f32.xlu0 %v1125_v49  ;;  %v1134_v52 = vadd.f32 %v1133_v51, %v1132_v50 }
 0x184   : > { %1135 = vadd.xlane.f32.xlu1 %v1134_v52 }
 0x20b   : > { %v1127_v54 = vpop.xlane.xlu0 %1126 }
 0x20c   : > { %v1128_v56 = vadd.f32 %v1127_v54, %v1124_v53 }
 0x20d   : > { %v1136_v57 = vpop.xlane.xlu1 %1135 }
 0x20e   : > { %1130 = vst.msk [vmem:[#allocation2] sm:$0xff] %vm223_vm15, %v1128_v56  ;;  %v1137_v58 = vadd.f32 %v1136_v57, %v1131_v55 }
 0x210   : > { %1138 = vst.msk [vmem:[#allocation3] sm:$0xff] %vm223_vm15, %v1137_v58 }
 0x215   : > { %v1142_v59 = vld [vmem:[#allocation2] sm:$0xff] }
 0x216   : > { %1143 = vst.msk [vmem:[%s218_s4] sm:$0xff] %vm223_vm15, %v1142_v59 }
 0x217   : > { %v1144_v60 = vld [vmem:[#allocation3] sm:$0xff] }
 0x218   : > { %1146 = vrot.lane.b32.xlu0 %v1144_v60, %s1390_s5 }
 0x28a   : > { %v1147_v61 = vpop.permute.xlu0 %1146 }
 0x28b   : > { %1150 = vst.msk [vmem:[%s218_s4] sm:$0xff] %vm1149_vm0, %v1147_v61 }
 0x28c PF: > { %s14_s14 = sadd.s32 1, %s1378_s14   ;;  %s1576_s12 = smov %s1374_s13 }
 0x28d   : > { %p11_p5 = scmp.ge.s32.totalorder %s14_s14, 4   ;;  %s1577_s13 = smov %s1579_s15 }
 0x28f   :  { %13 = sbr.rel (!%p11_p5) target bundleno = 2 (0x2), region = 86 }

</bundles_post_ra>
